<compile_context>
chip_gen: v6e
topology: v6e:2x2x1
jax: 0.10.0
libtpu: 0.0.40
codegen_flags: <defaults>
</compile_context>

<pallas_src>
import functools

import jax
import jax.numpy as jnp
from jax import lax
from jax.experimental import pallas as pl
from jax.experimental.pallas import tpu as pltpu

BN_EPS = 1e-5
LANE = 128


def _round_up(x, m):
    return (x + m - 1) // m * m


# ---------------- Pass 1: conv matmul + per-tile BN stats (no y to HBM) ------
def _conv_stats_kernel(p_ref, w_ref, mean_ref, m2_ref, *, tm, tpi, last_valid):
    # (tm, K) bf16 patches x (F, K) bf16 weights contracted over K on the MXU,
    # f32 accumulation -> y (tm, F).
    p = p_ref[0]
    y = lax.dot_general(p, w_ref[...], (((1,), (1,)), ((), ())),
                        preferred_element_type=jnp.float32)
    # Rows past `valid` are zero-padded patch rows (y == 0): they add 0 to the
    # sum and are masked out of the squared-deviation accumulation.
    s = pl.program_id(1)
    valid = jnp.where(s == tpi - 1, last_valid, tm)
    s1 = jnp.sum(y, axis=0, keepdims=True)                    # (1, F)
    mean_t = s1 / valid.astype(jnp.float32)
    row = lax.broadcasted_iota(jnp.int32, y.shape, 0)
    d = jnp.where(row < valid, y - mean_t, 0.0)
    m2_t = jnp.sum(d * d, axis=0, keepdims=True)              # (1, F)
    mean_ref[0, 0] = mean_t                                   # plain row vst
    m2_ref[0, 0] = m2_t                                       # plain row vst


# ---------------- Pass 2: recompute conv, BN normalize, ReLU, NCHW store -----
def _conv_bn_relu_kernel(mv_ref, p_ref, w_ref, o_ref):
    p = p_ref[0]                                              # (tm, K) bf16
    # Feature-major matmul: (F, K) x (tm, K)^T -> (F, tm); the store below is
    # therefore already in NCHW order (no wrapper transpose of the output).
    yt = lax.dot_general(w_ref[...], p, (((1,), (1,)), ((), ())),
                         preferred_element_type=jnp.float32)  # (F, tm)
    mean = mv_ref[:, 0:1]                                     # (F, 1)
    inv_std = mv_ref[:, 1:2]                                  # (F, 1)
    o_ref[0] = jnp.maximum((yt - mean) * inv_std, 0.0)


def _im2col_nhwc(x_nhwc, kh, kw, stride, padding):
    """x: [N,H,W,C] -> patches [N, OH*OW, kh*kw*C], feature order (ki, kj, c)."""
    n, h, w, c = x_nhwc.shape
    oh = (h + 2 * padding - kh) // stride + 1
    ow = (w + 2 * padding - kw) // stride + 1
    xp = jnp.pad(x_nhwc, ((0, 0), (padding, padding), (padding, padding), (0, 0)))
    taps = []
    for i in range(kh):
        for j in range(kw):
            taps.append(xp[:, i:i + stride * (oh - 1) + 1:stride,
                            j:j + stride * (ow - 1) + 1:stride, :])
    patches = jnp.stack(taps, axis=3).reshape(n, oh * ow, kh * kw * c)
    return patches, oh, ow


@functools.partial(jax.jit,
                   static_argnames=("stride", "padding", "block_m", "nhwc_out"))
def conv_residual_forward(x, weight, bias=None, *, stride=2, padding=1,
                          block_m=1024, nhwc_out=False):
    """x: [N,C,H,W] f32; weight: [F,C,3,3]; bias: [F] (dropped, see below).

    Returns [N,F,OH,OW] f32 (or [N,OH,OW,F] if nhwc_out=True).
    NOTE: matmul operands are cast to bf16 (f32 accumulation) — a deliberate
    precision trade worth ~1e-2 abs error vs an f32-exact conv.
    """
    # BatchNorm2d(affine=False, track_running_stats=False) subtracts the batch
    # mean per channel, which exactly cancels a constant per-channel bias.
    # Valid ONLY for this exact module config (no affine, no running stats).
    del bias

    n, c, h, w = x.shape
    f, _, kh, kw = weight.shape
    compute_dtype = jnp.bfloat16

    x_nhwc = jnp.transpose(x, (0, 2, 3, 1)).astype(compute_dtype)
    patches, oh, ow = _im2col_nhwc(x_nhwc, kh, kw, stride, padding)  # (N,OHW,K)
    k = patches.shape[-1]
    ohw = oh * ow

    # Tile the flattened per-image OH*OW dimension. No K/F zero-padding in HBM:
    # full-extent block dims are exempt from the (8,128) rule, so the mem-bound
    # kernel only moves real bytes; lane padding happens for free in vregs.
    f_pad = _round_up(f, 8)
    ohw8 = _round_up(ohw, 8)
    tm = ohw8 if ohw8 <= block_m else _round_up(block_m, LANE)
    ohw_pad = _round_up(ohw, tm)
    tpi = ohw_pad // tm                       # tiles per image
    last_valid = ohw - (tpi - 1) * tm         # valid rows in each last tile

    if ohw_pad != ohw:
        patches = jnp.pad(patches, ((0, 0), (0, ohw_pad - ohw), (0, 0)))
    w_fk = jnp.transpose(weight, (0, 2, 3, 1)).reshape(f, k).astype(compute_dtype)
    if f_pad != f:
        w_fk = jnp.pad(w_fk, ((0, f_pad - f), (0, 0)))

    grid = (n, tpi)                           # >= 2 steps for batch >= 2 (v7x)
    patch_spec = pl.BlockSpec((1, tm, k), lambda ni, si: (ni, si, 0))
    w_spec = pl.BlockSpec((f_pad, k), lambda ni, si: (0, 0))
    stat_spec = pl.BlockSpec((1, 1, 1, f_pad), lambda ni, si: (ni, si, 0, 0))

    # ---------- Pass 1: per-tile BN statistics only ----------------------------
    stats_kernel = functools.partial(_conv_stats_kernel, tm=tm, tpi=tpi,
                                     last_valid=last_valid)
    cost1 = pl.CostEstimate(
        flops=2 * n * ohw_pad * k * f_pad, transcendentals=0,
        bytes_accessed=(patches.size * 2 + w_fk.size * 2 + 2 * n * tpi * f_pad * 4))
    mean_t, m2_t = pl.pallas_call(
        stats_kernel,
        out_shape=(jax.ShapeDtypeStruct((n, tpi, 1, f_pad), jnp.float32),
                   jax.ShapeDtypeStruct((n, tpi, 1, f_pad), jnp.float32)),
        grid=grid,
        in_specs=[patch_spec, w_spec],
        out_specs=[stat_spec, stat_spec],
        compiler_params=pltpu.CompilerParams(
            dimension_semantics=("parallel", "parallel")),
        cost_estimate=cost1,
    )(patches, w_fk)

    # ---------- Chan/Welford merge of per-tile stats (tiny, stable) ------------
    m_total = float(n * ohw)
    counts = jnp.asarray([tm] * (tpi - 1) + [last_valid], jnp.float32)  # (tpi,)
    mean_t = mean_t[:, :, 0, :]                                         # (N,tpi,F)
    m2_t = m2_t[:, :, 0, :]
    cw = counts[None, :, None]
    mean = jnp.sum(cw * mean_t, axis=(0, 1)) / m_total                  # (F,)
    m2 = (jnp.sum(m2_t, axis=(0, 1))
          + jnp.sum(cw * (mean_t - mean) ** 2, axis=(0, 1)))
    inv_std = lax.rsqrt(m2 / m_total + BN_EPS)
    mv = jnp.stack([mean, inv_std], axis=1)                             # (F, 2)

    # ---------- Pass 2: recompute conv, BN + ReLU, NCHW-layout store -----------
    cost2 = pl.CostEstimate(
        flops=2 * n * ohw_pad * k * f_pad + 3 * n * ohw_pad * f_pad,
        transcendentals=0,
        bytes_accessed=(patches.size * 2 + w_fk.size * 2 + mv.size * 4
                        + n * f_pad * ohw_pad * 4))
    out = pl.pallas_call(
        _conv_bn_relu_kernel,
        out_shape=jax.ShapeDtypeStruct((n, f_pad, ohw_pad), jnp.float32),
        grid=grid,
        in_specs=[pl.BlockSpec((f_pad, 2), lambda ni, si: (0, 0)),
                  patch_spec, w_spec],
        out_specs=pl.BlockSpec((1, f_pad, tm), lambda ni, si: (ni, 0, si)),
        compiler_params=pltpu.CompilerParams(
            dimension_semantics=("parallel", "parallel")),
        cost_estimate=cost2,
    )(mv, patches, w_fk)

    out = out[:, :f, :ohw].reshape(n, f, oh, ow)   # no-op slices when aligned
    if nhwc_out:
        return jnp.transpose(out, (0, 2, 3, 1))
    return out                                     # PyTorch NCHW contract


def _reference(x, weight, bias, *, stride=2, padding=1):
    """Pure-JAX f32 reference (conv + bias + batch-stat BN + ReLU)."""
    y = lax.conv_general_dilated(
        x, weight, window_strides=(stride, stride),
        padding=[(padding, padding), (padding, padding)],
        dimension_numbers=("NCHW", "OIHW", "NCHW"),
    ) + bias.reshape(1, -1, 1, 1)
    mean = jnp.mean(y, axis=(0, 2, 3), keepdims=True)
    var = jnp.mean((y - mean) ** 2, axis=(0, 2, 3), keepdims=True)
    return jnp.maximum((y - mean) * lax.rsqrt(var + BN_EPS), 0.0)


if __name__ == "__main__":
    # Small shapes consistent with ConvResidual(ch=4, filters=64, stride=2, pad=1)
    N, CH, H, W = 2, 4, 16, 16
    FILTERS = 64

    key = jax.random.PRNGKey(0)
    kx, kw_, kb = jax.random.split(key, 3)
    x = jax.random.normal(kx, (N, CH, H, W), dtype=jnp.float32)
    fan_in = CH * 3 * 3
    bound = 1.0 / (fan_in ** 0.5)
    weight = jax.random.uniform(kw_, (FILTERS, CH, 3, 3), jnp.float32, -bound, bound)
    bias = jax.random.uniform(kb, (FILTERS,), jnp.float32, -bound, bound)

    out = conv_residual_forward(x, weight, bias, stride=2, padding=1)
    out = jax.block_until_ready(out)

    ref = jax.block_until_ready(_reference(x, weight, bias, stride=2, padding=1))
    assert out.shape == (N, FILTERS, H // 2, W // 2), out.shape
    # bf16 matmul operands (f32 accumulation / f32 BN) -> loosened tolerance.
    err = float(jnp.max(jnp.abs(out - ref)))
    assert err < 3e-2, err

    print("KERNEL_OK")
</pallas_src>

<mosaic_0001>
module attributes {stable_mosaic.version = 11 : i64} {
  func.func @_conv_stats_kernel(%arg0: i32, %arg1: i32, %arg2: memref<1x64x36xbf16, #tpu.memory_space<vmem>>, %arg3: memref<64x36xbf16, #tpu.memory_space<vmem>>, %arg4: memref<1x1x1x64xf32, #tpu.memory_space<vmem>>, %arg5: memref<1x1x1x64xf32, #tpu.memory_space<vmem>>) attributes {dimension_semantics = [#tpu.dimension_semantics<parallel>, #tpu.dimension_semantics<parallel>], iteration_bounds = array<i64: 2, 1>, scalar_prefetch = 0 : i64, scratch_operands = 0 : i64, tpu.core_type = #tpu.core_type<tc>, window_params = [{transform_indices = @transform_0, window_bounds = array<i64: 1, 64, 36>}, {pipeline_mode = #tpu.pipeline_mode<synchronous>, transform_indices = @transform_1, window_bounds = array<i64: 64, 36>}, {transform_indices = @transform_2, window_bounds = array<i64: 1, 1, 1, 64>}, {transform_indices = @transform_3, window_bounds = array<i64: 1, 1, 1, 64>}]} {
    %c0 = arith.constant 0 : index
    %c0_0 = arith.constant 0 : index
    %c0_1 = arith.constant 0 : index
    %0 = vector.load %arg2[%c0, %c0_0, %c0_1] : memref<1x64x36xbf16, #tpu.memory_space<vmem>>, vector<1x64x36xbf16>
    %1 = vector.shape_cast %0 : vector<1x64x36xbf16> to vector<64x36xbf16>
    %c0_2 = arith.constant 0 : index
    %c0_3 = arith.constant 0 : index
    %2 = vector.load %arg3[%c0_2, %c0_3] : memref<64x36xbf16, #tpu.memory_space<vmem>>, vector<64x36xbf16>
    %cst = arith.constant dense<0.000000e+00> : vector<64x64xf32>
    %3 = tpu.matmul %1, %2, %cst {dimension_numbers = #tpu.dot_dimension_numbers<[1], [1], [0], [0], [0, 0, 1, 0], [], []>} : vector<64x36xbf16>, vector<64x36xbf16>, vector<64x64xf32> -> vector<64x64xf32>
    %c0_i32 = arith.constant 0 : i32
    %4 = arith.cmpi eq, %arg1, %c0_i32 : i32
    %c64_i32 = arith.constant 64 : i32
    %c64_i32_4 = arith.constant 64 : i32
    %5 = arith.select %4, %c64_i32, %c64_i32_4 : i32
    %cst_5 = arith.constant dense<0.000000e+00> : vector<64xf32>
    %6 = vector.multi_reduction <add>, %3, %cst_5 [0] : vector<64x64xf32> to vector<64xf32>
    %7 = vector.shape_cast %6 : vector<64xf32> to vector<1x64xf32>
    %8 = arith.sitofp %5 : i32 to f32
    %9 = vector.broadcast %8 : f32 to vector<1x64xf32>
    %10 = arith.divf %7, %9 : vector<1x64xf32>
    %11 = tpu.iota {dimensions = array<i32: 0>} : vector<64x64xi32>
    %12 = vector.broadcast %5 : i32 to vector<64x64xi32>
    %13 = arith.cmpi slt, %11, %12 : vector<64x64xi32>
    %14 = vector.broadcast %10 : vector<1x64xf32> to vector<64x64xf32>
    %15 = arith.subf %3, %14 : vector<64x64xf32>
    %cst_6 = arith.constant 0.000000e+00 : f32
    %16 = vector.broadcast %cst_6 : f32 to vector<64x64xf32>
    %17 = arith.select %13, %15, %16 : vector<64x64xi1>, vector<64x64xf32>
    %18 = arith.mulf %17, %17 : vector<64x64xf32>
    %cst_7 = arith.constant dense<0.000000e+00> : vector<64xf32>
    %19 = vector.multi_reduction <add>, %18, %cst_7 [0] : vector<64x64xf32> to vector<64xf32>
    %20 = vector.shape_cast %19 : vector<64xf32> to vector<1x64xf32>
    %c0_8 = arith.constant 0 : index
    %c0_9 = arith.constant 0 : index
    %c0_10 = arith.constant 0 : index
    %c0_11 = arith.constant 0 : index
    %21 = vector.load %arg4[%c0_8, %c0_9, %c0_10, %c0_11] : memref<1x1x1x64xf32, #tpu.memory_space<vmem>>, vector<1x1x1x64xf32>
    %22 = vector.shape_cast %21 : vector<1x1x1x64xf32> to vector<1x64xf32>
    %23 = vector.shape_cast %10 : vector<1x64xf32> to vector<1x1x1x64xf32>
    tpu.vector_store %arg4[%c0_8, %c0_9, %c0_10, %c0_11], %23 {strides = array<i32>} : memref<1x1x1x64xf32, #tpu.memory_space<vmem>>, vector<1x1x1x64xf32>,
    %c0_12 = arith.constant 0 : index
    %c0_13 = arith.constant 0 : index
    %c0_14 = arith.constant 0 : index
    %c0_15 = arith.constant 0 : index
    %24 = vector.load %arg5[%c0_12, %c0_13, %c0_14, %c0_15] : memref<1x1x1x64xf32, #tpu.memory_space<vmem>>, vector<1x1x1x64xf32>
    %25 = vector.shape_cast %24 : vector<1x1x1x64xf32> to vector<1x64xf32>
    %26 = vector.shape_cast %20 : vector<1x64xf32> to vector<1x1x1x64xf32>
    tpu.vector_store %arg5[%c0_12, %c0_13, %c0_14, %c0_15], %26 {strides = array<i32>} : memref<1x1x1x64xf32, #tpu.memory_space<vmem>>, vector<1x1x1x64xf32>,
    return
  }
  func.func @transform_0(%arg0: i32, %arg1: i32) -> (i32, i32, i32) {
    %c0_i32 = arith.constant 0 : i32
    %c0_i32_0 = arith.constant 0 : i32
    return %arg0, %arg1, %c0_i32 : i32, i32, i32
  }
  func.func @transform_1(%arg0: i32, %arg1: i32) -> (i32, i32) {
    %c0_i32 = arith.constant 0 : i32
    %c0_i32_0 = arith.constant 0 : i32
    %c0_i32_1 = arith.constant 0 : i32
    return %c0_i32, %c0_i32_0 : i32, i32
  }
  func.func @transform_2(%arg0: i32, %arg1: i32) -> (i32, i32, i32, i32) {
    %c0_i32 = arith.constant 0 : i32
    %c0_i32_0 = arith.constant 0 : i32
    %c0_i32_1 = arith.constant 0 : i32
    return %arg0, %arg1, %c0_i32, %c0_i32_0 : i32, i32, i32, i32
  }
  func.func @transform_3(%arg0: i32, %arg1: i32) -> (i32, i32, i32, i32) {
    %c0_i32 = arith.constant 0 : i32
    %c0_i32_0 = arith.constant 0 : i32
    %c0_i32_1 = arith.constant 0 : i32
    return %arg0, %arg1, %c0_i32, %c0_i32_0 : i32, i32, i32, i32
  }
}

module attributes {stable_mosaic.version = 11 : i64} {
  func.func @_conv_bn_relu_kernel(%arg0: i32, %arg1: i32, %arg2: memref<64x2xf32, #tpu.memory_space<vmem>>, %arg3: memref<1x64x36xbf16, #tpu.memory_space<vmem>>, %arg4: memref<64x36xbf16, #tpu.memory_space<vmem>>, %arg5: memref<1x64x64xf32, #tpu.memory_space<vmem>>) attributes {dimension_semantics = [#tpu.dimension_semantics<parallel>, #tpu.dimension_semantics<parallel>], iteration_bounds = array<i64: 2, 1>, scalar_prefetch = 0 : i64, scratch_operands = 0 : i64, tpu.core_type = #tpu.core_type<tc>, window_params = [{pipeline_mode = #tpu.pipeline_mode<synchronous>, transform_indices = @transform_0, window_bounds = array<i64: 64, 2>}, {transform_indices = @transform_1, window_bounds = array<i64: 1, 64, 36>}, {pipeline_mode = #tpu.pipeline_mode<synchronous>, transform_indices = @transform_2, window_bounds = array<i64: 64, 36>}, {transform_indices = @transform_3, window_bounds = array<i64: 1, 64, 64>}]} {
    %c0 = arith.constant 0 : index
    %c0_0 = arith.constant 0 : index
    %c0_1 = arith.constant 0 : index
    %0 = vector.load %arg3[%c0, %c0_0, %c0_1] : memref<1x64x36xbf16, #tpu.memory_space<vmem>>, vector<1x64x36xbf16>
    %1 = vector.shape_cast %0 : vector<1x64x36xbf16> to vector<64x36xbf16>
    %c0_2 = arith.constant 0 : index
    %c0_3 = arith.constant 0 : index
    %2 = vector.load %arg4[%c0_2, %c0_3] : memref<64x36xbf16, #tpu.memory_space<vmem>>, vector<64x36xbf16>
    %cst = arith.constant dense<0.000000e+00> : vector<64x64xf32>
    %3 = tpu.matmul %2, %1, %cst {dimension_numbers = #tpu.dot_dimension_numbers<[1], [1], [0], [0], [0, 0, 1, 0], [], []>} : vector<64x36xbf16>, vector<64x36xbf16>, vector<64x64xf32> -> vector<64x64xf32>
    %c0_4 = arith.constant 0 : index
    %c0_5 = arith.constant 0 : index
    %4 = vector.load %arg2[%c0_4, %c0_5] : memref<64x2xf32, #tpu.memory_space<vmem>>, vector<64x1xf32>
    %c0_6 = arith.constant 0 : index
    %c1 = arith.constant 1 : index
    %5 = vector.load %arg2[%c0_6, %c1] : memref<64x2xf32, #tpu.memory_space<vmem>>, vector<64x1xf32>
    %6 = vector.broadcast %4 : vector<64x1xf32> to vector<64x64xf32>
    %7 = arith.subf %3, %6 : vector<64x64xf32>
    %8 = vector.broadcast %5 : vector<64x1xf32> to vector<64x64xf32>
    %9 = arith.mulf %7, %8 : vector<64x64xf32>
    %cst_7 = arith.constant 0.000000e+00 : f32
    %10 = vector.broadcast %cst_7 : f32 to vector<64x64xf32>
    %11 = arith.maximumf %9, %10 : vector<64x64xf32>
    %c0_8 = arith.constant 0 : index
    %c0_9 = arith.constant 0 : index
    %c0_10 = arith.constant 0 : index
    %12 = vector.load %arg5[%c0_8, %c0_9, %c0_10] : memref<1x64x64xf32, #tpu.memory_space<vmem>>, vector<1x64x64xf32>
    %13 = vector.shape_cast %12 : vector<1x64x64xf32> to vector<64x64xf32>
    %14 = vector.shape_cast %11 : vector<64x64xf32> to vector<1x64x64xf32>
    tpu.vector_store %arg5[%c0_8, %c0_9, %c0_10], %14 {strides = array<i32>} : memref<1x64x64xf32, #tpu.memory_space<vmem>>, vector<1x64x64xf32>,
    return
  }
  func.func @transform_0(%arg0: i32, %arg1: i32) -> (i32, i32) {
    %c0_i32 = arith.constant 0 : i32
    %c0_i32_0 = arith.constant 0 : i32
    %c0_i32_1 = arith.constant 0 : i32
    return %c0_i32, %c0_i32_0 : i32, i32
  }
  func.func @transform_1(%arg0: i32, %arg1: i32) -> (i32, i32, i32) {
    %c0_i32 = arith.constant 0 : i32
    %c0_i32_0 = arith.constant 0 : i32
    return %arg0, %arg1, %c0_i32 : i32, i32, i32
  }
  func.func @transform_2(%arg0: i32, %arg1: i32) -> (i32, i32) {
    %c0_i32 = arith.constant 0 : i32
    %c0_i32_0 = arith.constant 0 : i32
    %c0_i32_1 = arith.constant 0 : i32
    return %c0_i32, %c0_i32_0 : i32, i32
  }
  func.func @transform_3(%arg0: i32, %arg1: i32) -> (i32, i32, i32) {
    %c0_i32 = arith.constant 0 : i32
    %c0_i32_0 = arith.constant 0 : i32
    return %arg0, %c0_i32, %arg1 : i32, i32, i32
  }
}

</mosaic_0001>

<bundles_post_ra>
// kernel: conv_residual_forward.2
= control target key start
LH: loop header
LB: loop body
LE: loop exit
PB: predicated region body
PF: predicated region fallthrough
CT: control target
= control target key end

     0   :  { %s700_s12 = smov 0   ;;  %s702_s13 = smov 0   ;;  %s787_s0 = inlined_call_operand.vmem [shape: bf16[2,64,36], index: 0, kind: input, shape index: {}]   ;;  %s788_s1 = inlined_call_operand.vmem [shape: bf16[64,36], index: 1, kind: input, shape index: {}]   ;;  %s789_s2 = inlined_call_operand.vmem [shape: f32[2,1,1,64], index: 2, kind: output, shape index: {0}]   ;;  %s790_s3 = inlined_call_operand.vmem [shape: f32[2,1,1,64], index: 3, kind: output, shape index: {1}]  }
   0x1   :  { %s704_s14 = smov 0  }
   0x2 LB: > { %s26_s15 = sadd.s32 1, %s674_s13  ;;  %p566_p0 = scmp.ge.s32.totalorder %s678_s14, 1  ;;  %s678_s14 = sphi %s704_s14, %s14_s14   ;;  %s674_s13 = sphi %s702_s13, %s792_s13   ;;  %s670_s12 = sphi %s700_s12, %s791_s12  }
   0x3   : > { %p28_p1 = scmp.ge.s32.totalorder %s26_s15, 2  ;;  %p163_p2 = scmp.lt.s32.totalorder %s678_s14, 3 }
   0x5   : > { %s794_s15 = smov (%p28_p1, %s26_s15), 0  ;;  %p164_p3 = pnand %p566_p0, %p163_p2 }
   0x6   : > { %p199_p4 = scmp.lt.s32.totalorder (!%p164_p3), %s670_s12, 1 }
   0x7   : > { %167 = sbr.rel (%p164_p3) target bundleno = 305 (0x131), region = 28 }
   0xc   : > { %v648_v0 = vld [vmem:[%s788_s1 + $0x18] sm:$0xff]   ;;  %vm277_vm0 = vcmask 293888   ;;  %v649_v1 = vld [vmem:[%s788_s1 + $0x10] sm:$0xff]   ;;  %s796_s12 = smov (!%p199_p4, %s670_s12), 1  ;;  %v650_v3 = vld [vmem:[%s788_s1 + $0x8] sm:$0xff]   ;;  %vm367_vm1 = vcmask 523264  }
   0xd   : > { %616 = vmatprep.subr.msk.bf16.mxu0 %vm277_vm0, %v648_v0  ;;  %v300_v2 = vsel %vm277_vm0, %v648_v0, 0  ;;  %617 = vmatprep.subr.msk.bf16.mxu1 %vm277_vm0, %v648_v0  ;;  %s583_s20 = sshll.u32 %s796_s12, 5  ;;  %v297_v4 = vsel %vm277_vm0, %v649_v1, 0  ;;  %v294_v7 = vsel %vm277_vm0, %v650_v3, 0  ;;  %v651_v8 = vld [vmem:[%s788_s1] sm:$0xff]   ;;  %s213_s30 = scalar_lea.vmem %s789_s2, %s796_s12  ;;  %vm453_vm2 = vcmask 516096  }
   0xe   : > { %593 = vmatpush3.bf16.xpose.msra.mxu0 %v300_v2  ;;  %612 = vmatpush3.bf16.xpose.msra.mxu1 %v300_v2  ;;  %s206_s25 = scalar_lea.vmem %s787_s0, %s583_s20  ;;  %v291_v9 = vsel %vm277_vm0, %v651_v8, 0  ;;  %s219_s6 = scalar_lea.vmem %s790_s3, %s796_s12 }
   0xf   : > { %618 = vmatprep.subr.msk.bf16.mxu0 %vm277_vm0, %v649_v1  ;;  %619 = vmatprep.subr.msk.bf16.mxu1 %vm277_vm0, %v649_v1  ;;  %v652_v5 = vld [vmem:[%s206_s25] sm:$0xff]   ;;  %v654_v6 = vld [vmem:[%s206_s25 + $0x10] sm:$0xff]   ;;  %v653_v10 = vld [vmem:[%s206_s25 + $0x8] sm:$0xff]  }
  0x10   : > { %600 = vmatprep.mubr.msk.bf16.mxu0 %vm277_vm0, %v652_v5  ;;  %604 = vmatprep.mubr.msk.bf16.mxu1 %vm277_vm0, %v654_v6  ;;  %v655_v11 = vld [vmem:[%s206_s25 + $0x18] sm:$0xff]  }
  0x16   : > { %595 = vmatpush3.bf16.xpose.msra.mxu0 %v297_v4  ;;  %613 = vmatpush3.bf16.xpose.msra.mxu1 %v297_v4 }
  0x17   : > { %620 = vmatprep.subr.msk.bf16.mxu0 %vm277_vm0, %v650_v3  ;;  %621 = vmatprep.subr.msk.bf16.mxu1 %vm277_vm0, %v650_v3 }
  0x1e   : > { %597 = vmatpush3.bf16.xpose.msra.mxu0 %v294_v7  ;;  %614 = vmatpush3.bf16.xpose.msra.mxu1 %v294_v7 }
  0x1f   : > { %622 = vmatprep.subr.msk.bf16.mxu0 %vm277_vm0, %v651_v8  ;;  %623 = vmatprep.subr.msk.bf16.mxu1 %vm277_vm0, %v651_v8 }
  0x26   : > { %599 = vmatpush3.bf16.xpose.msra.mxu0 %v291_v9  ;;  %615 = vmatpush3.bf16.xpose.msra.mxu1 %v291_v9 }
  0x2d   : > { %601 = vmatmul.mubr.msk.bf16.vlgmr.msra.gmra.mxu0 %vm277_vm0, %v653_v10  ;;  %605 = vmatmul.mubr.msk.bf16.vlgmr.msra.gmra.mxu1 %vm277_vm0, %v655_v11 }
  0xed   : > { %v602_v12 = vpop.f32.mrf.mxu0  ;;  %v606_v13 = vpop.f32.mrf.mxu1 }
  0xee   : > { %v371_v22 = vsel %vm367_vm1, %v602_v12, 0.0  ;;  %v379_v31 = vsel %vm367_vm1, %v606_v13, 0.0 }
  0xef   : > { %v336_v14 = vpop.f32.mrf.mxu0  ;;  %v352_v16 = vpop.f32.mrf.mxu1 }
  0xf0   : > { %v368_v18 = vsel %vm367_vm1, %v336_v14, 0.0  ;;  %v375_v27 = vsel %vm367_vm1, %v352_v16, 0.0 }
  0xf1   : > { %v603_v15 = vpop.f32.mrf.mxu0  ;;  %v607_v21 = vpop.f32.mrf.mxu1 }
  0xf2   : > { %v373_v24 = vsel %vm367_vm1, %v603_v15, 0.0  ;;  %v381_v33 = vsel %vm367_vm1, %v607_v21, 0.0 }
  0xf3   : > { %v339_v17 = vpop.f32.mrf.mxu0  ;;  %v355_v25 = vpop.f32.mrf.mxu1 }
  0xf4   : > { %v369_v19 = vsel %vm367_vm1, %v339_v17, 0.0  ;;  %v377_v29 = vsel %vm367_vm1, %v355_v25, 0.0 }
  0xf5   : > { %v370_v20 = vadd.f32 %v369_v19, %v368_v18 }
  0xf7   : > { %v372_v23 = vadd.f32 %v371_v22, %v370_v20 }
  0xf9   : > { %v374_v26 = vadd.f32 %v373_v24, %v372_v23 }
  0xfb   : > { %v376_v28 = vadd.f32 %v375_v27, %v374_v26 }
  0xfd   : > { %v378_v30 = vadd.f32 %v377_v29, %v376_v28 }
  0xff   : > { %v380_v32 = vadd.f32 %v379_v31, %v378_v30 }
 0x101   : > { %v382_v34 = vadd.f32 %v381_v33, %v380_v32 }
 0x103   : > { %v383_v35 = vrot.slane %v382_v34, 4 }
 0x105   : > { %v384_v36 = vadd.f32 %v383_v35, %v382_v34 }
 0x107   : > { %v385_v37 = vrot.slane %v384_v36, 2 }
 0x109   : > { %v386_v38 = vadd.f32 %v385_v37, %v384_v36 }
 0x10b   : > { %v387_v39 = vrot.slane %v386_v38, 1 }
 0x10d   : > { %v388_v40 = vadd.f32 %v387_v39, %v386_v38 }
 0x10f   : > { %v390_v41 = vmul.f32 0.015625, %v388_v40 }
 0x111   : > { %v408_v42 = vsub.f32 %v336_v14, %v390_v41  ;;  %v409_v43 = vsub.f32 %v339_v17, %v390_v41  ;;  %v410_v44 = vsub.f32 %v602_v12, %v390_v41  ;;  %v411_v45 = vsub.f32 %v603_v15, %v390_v41  ;;  %454 = vst.msk [vmem:[%s213_s30] sm:$0x1] %vm453_vm2, %v390_v41 }
 0x112   : > { %v412_v46 = vsub.f32 %v352_v16, %v390_v41  ;;  %v413_v50 = vsub.f32 %v355_v25, %v390_v41  ;;  %v414_v55 = vsub.f32 %v606_v13, %v390_v41  ;;  %v415_v59 = vsub.f32 %v607_v21, %v390_v41 }
 0x113   : > { %v424_v47 = vmul.f32 %v408_v42, %v408_v42  ;;  %v425_v48 = vmul.f32 %v409_v43, %v409_v43  ;;  %v426_v49 = vmul.f32 %v410_v44, %v410_v44  ;;  %v427_v51 = vmul.f32 %v411_v45, %v411_v45 }
 0x114   : > { %v428_v56 = vmul.f32 %v412_v46, %v412_v46  ;;  %v429_v60 = vmul.f32 %v413_v50, %v413_v50  ;;  %v430_v63 = vmul.f32 %v414_v55, %v414_v55  ;;  %v431_v2 = vmul.f32 %v415_v59, %v415_v59 }
 0x115   : > { %v432_v52 = vsel %vm367_vm1, %v424_v47, 0.0  ;;  %v433_v53 = vsel %vm367_vm1, %v425_v48, 0.0  ;;  %v435_v57 = vsel %vm367_vm1, %v426_v49, 0.0  ;;  %v437_v61 = vsel %vm367_vm1, %v427_v51, 0.0 }
 0x116   : > { %v434_v54 = vadd.f32 %v433_v53, %v432_v52  ;;  %v439_v0 = vsel %vm367_vm1, %v428_v56, 0.0  ;;  %v441_v3 = vsel %vm367_vm1, %v429_v60, 0.0  ;;  %v443_v5 = vsel %vm367_vm1, %v430_v63, 0.0 }
 0x117   : > { %v445_v7 = vsel %vm367_vm1, %v431_v2, 0.0 }
 0x118   : > { %v436_v58 = vadd.f32 %v435_v57, %v434_v54 }
 0x11a   : > { %v438_v62 = vadd.f32 %v437_v61, %v436_v58 }
 0x11c   : > { %v440_v1 = vadd.f32 %v439_v0, %v438_v62 }
 0x11e   : > { %v442_v4 = vadd.f32 %v441_v3, %v440_v1 }
 0x120   : > { %v444_v6 = vadd.f32 %v443_v5, %v442_v4 }
 0x122   : > { %v446_v8 = vadd.f32 %v445_v7, %v444_v6 }
 0x124   : > { %v447_v9 = vrot.slane %v446_v8, 4 }
 0x126   : > { %v448_v10 = vadd.f32 %v447_v9, %v446_v8 }
 0x128   : > { %v449_v11 = vrot.slane %v448_v10, 2 }
 0x12a   : > { %v450_v12 = vadd.f32 %v449_v11, %v448_v10 }
 0x12c   : > { %v451_v13 = vrot.slane %v450_v12, 1 }
 0x12e   : > { %v452_v14 = vadd.f32 %v451_v13, %v450_v12 }
 0x130   : > { %455 = vst.msk [vmem:[%s219_s6] sm:$0x1] %vm453_vm2, %v452_v14 }
 0x131 PF: > { %s14_s14 = sadd.s32 1, %s678_s14   ;;  %s791_s12 = smov %s674_s13 }
 0x132   : > { %p11_p5 = scmp.ge.s32.totalorder %s14_s14, 4   ;;  %s792_s13 = smov %s794_s15 }
 0x134   :  { %13 = sbr.rel (!%p11_p5) target bundleno = 2 (0x2), region = 70 }

// kernel: conv_residual_forward.3
= control target key start
LH: loop header
LB: loop body
LE: loop exit
PB: predicated region body
PF: predicated region fallthrough
CT: control target
= control target key end

     0   :  { %s699_s12 = smov 0   ;;  %s701_s13 = smov 0   ;;  %s812_s0 = inlined_call_operand.vmem [shape: f32[64,2], index: 0, kind: input, shape index: {}]   ;;  %s813_s1 = inlined_call_operand.vmem [shape: bf16[2,64,36], index: 1, kind: input, shape index: {}]   ;;  %s814_s2 = inlined_call_operand.vmem [shape: bf16[64,36], index: 2, kind: input, shape index: {}]   ;;  %s815_s3 = inlined_call_operand.vmem [shape: f32[2,64,64], index: 3, kind: output, shape index: {}]  }
   0x1   :  { %s703_s14 = smov 0  }
   0x2 LB: > { %s25_s15 = sadd.s32 1, %s671_s13  ;;  %p554_p0 = scmp.ge.s32.totalorder %s675_s14, 1  ;;  %s675_s14 = sphi %s703_s14, %s13_s14   ;;  %s671_s13 = sphi %s701_s13, %s817_s13   ;;  %s667_s12 = sphi %s699_s12, %s816_s12  }
   0x3   : > { %p27_p1 = scmp.ge.s32.totalorder %s25_s15, 2  ;;  %p158_p2 = scmp.lt.s32.totalorder %s675_s14, 3 }
   0x5   : > { %s819_s15 = smov (%p27_p1, %s25_s15), 0  ;;  %p159_p3 = pnand %p554_p0, %p158_p2 }
   0x6   : > { %p190_p4 = scmp.lt.s32.totalorder (!%p159_p3), %s667_s12, 1 }
   0x7   : > { %162 = sbr.rel (%p159_p3) target bundleno = 254 (0xfe), region = 32 }
   0xc   : > { %vm264_vm0 = vcmask 293888   ;;  %v649_v0 = vld [vmem:[%s814_s2] sm:$0xff]   ;;  %s821_s12 = smov (!%p190_p4, %s667_s12), 1  ;;  %v650_v1 = vld [vmem:[%s814_s2 + $0x10] sm:$0xff]   ;;  %v677_v2 = vmov 0   ;;  %v357_v6 = vld [vmem:[%s812_s0 + $0x18] sm:$0xff] }
   0xd   : > { %642 = vset.pattern.permute.xlu1 %v677_v2  ;;  %641 = vset.pattern.permute.xlu0 %v677_v2  ;;  %s573_s20 = sshll.u32 %s821_s12, 5  ;;  %v356_v3 = vld [vmem:[%s812_s0 + $0x10] sm:$0xff]  ;;  %v354_v4 = vld [vmem:[%s812_s0] sm:$0xff]  ;;  %v355_v9 = vld [vmem:[%s812_s0 + $0x8] sm:$0xff]  ;;  %v678_v18 = vmov 1   ;;  %s574_s21 = sshll.u32 %s821_s12, 6 }
   0xe   : > { %591 = vmatprep.mubr.msk.bf16.mxu0 %vm264_vm0, %v649_v0  ;;  %595 = vmatprep.mubr.msk.bf16.mxu1 %vm264_vm0, %v650_v1  ;;  %s737_s27 = scalar_lea.vmem %s813_s1, %s573_s20  ;;  %v359_v10 = vld [vmem:[%s812_s0 + $0x28] sm:$0xff]  ;;  %v358_v11 = vld [vmem:[%s812_s0 + $0x20] sm:$0xff]  ;;  %v361_v14 = vld [vmem:[%s812_s0 + $0x38] sm:$0xff]  ;;  %s785_s24 = scalar_lea.vmem %s815_s3, %s574_s21  ;;  %vm458_vm1 = vcmask 523264  }
   0xf   : > { %374 = vperm.xlu1 %642, %v356_v3   ;;  %364 = vperm.xlu0 %641, %v354_v4   ;;  %v645_v5 = vld [vmem:[%s737_s27 + $0x18] sm:$0xff]   ;;  %v646_v7 = vld [vmem:[%s737_s27 + $0x10] sm:$0xff]   ;;  %v647_v13 = vld [vmem:[%s737_s27 + $0x8] sm:$0xff]  }
  0x10   : > { %607 = vmatprep.subr.msk.bf16.mxu0 %vm264_vm0, %v645_v5  ;;  %608 = vmatprep.subr.msk.bf16.mxu1 %vm264_vm0, %v645_v5  ;;  %v287_v8 = vsel %vm264_vm0, %v645_v5, 0  ;;  %v284_v12 = vsel %vm264_vm0, %v646_v7, 0  ;;  %v360_v15 = vld [vmem:[%s812_s0 + $0x30] sm:$0xff]  ;;  %v281_v16 = vsel %vm264_vm0, %v647_v13, 0  ;;  %v648_v17 = vld [vmem:[%s737_s27] sm:$0xff]   ;;  %v651_v20 = vld [vmem:[%s814_s2 + $0x8] sm:$0xff]  }
  0x11   : > { %584 = vmatpush3.bf16.xpose.msra.mxu0 %v287_v8  ;;  %603 = vmatpush3.bf16.xpose.msra.mxu1 %v287_v8  ;;  %v278_v19 = vsel %vm264_vm0, %v648_v17, 0  ;;  %v652_v21 = vld [vmem:[%s814_s2 + $0x18] sm:$0xff]  }
  0x12   : > { %609 = vmatprep.subr.msk.bf16.mxu0 %vm264_vm0, %v646_v7  ;;  %610 = vmatprep.subr.msk.bf16.mxu1 %vm264_vm0, %v646_v7 }
  0x13   : > { %379 = vperm.xlu1 %642, %v357_v6   ;;  %369 = vperm.xlu0 %641, %v355_v9  }
  0x17   : > { %389 = vperm.xlu1 %642, %v359_v10   ;;  %384 = vperm.xlu0 %641, %v358_v11  }
  0x19   : > { %586 = vmatpush3.bf16.xpose.msra.mxu0 %v284_v12  ;;  %604 = vmatpush3.bf16.xpose.msra.mxu1 %v284_v12 }
  0x1a   : > { %611 = vmatprep.subr.msk.bf16.mxu0 %vm264_vm0, %v647_v13  ;;  %612 = vmatprep.subr.msk.bf16.mxu1 %vm264_vm0, %v647_v13 }
  0x1b   : > { %399 = vperm.xlu1 %642, %v361_v14   ;;  %394 = vperm.xlu0 %641, %v360_v15  }
  0x1f   : > { %644 = vset.pattern.permute.xlu1 %v678_v18  ;;  %643 = vset.pattern.permute.xlu0 %v678_v18 }
  0x20   : > { %415 = vperm.xlu1 %644, %v355_v9   ;;  %411 = vperm.xlu0 %643, %v354_v4  }
  0x21   : > { %588 = vmatpush3.bf16.xpose.msra.mxu0 %v281_v16  ;;  %605 = vmatpush3.bf16.xpose.msra.mxu1 %v281_v16 }
  0x22   : > { %613 = vmatprep.subr.msk.bf16.mxu0 %vm264_vm0, %v648_v17  ;;  %614 = vmatprep.subr.msk.bf16.mxu1 %vm264_vm0, %v648_v17 }
  0x24   : > { %419 = vperm.xlu1 %644, %v356_v3   ;;  %423 = vperm.xlu0 %643, %v357_v6  }
  0x28   : > { %427 = vperm.xlu1 %644, %v358_v11   ;;  %431 = vperm.xlu0 %643, %v359_v10  }
  0x29   : > { %590 = vmatpush3.bf16.xpose.msra.mxu0 %v278_v19  ;;  %606 = vmatpush3.bf16.xpose.msra.mxu1 %v278_v19 }
  0x2c   : > { %435 = vperm.xlu1 %644, %v360_v15   ;;  %439 = vperm.xlu0 %643, %v361_v14  }
  0x30   : > { %592 = vmatmul.mubr.msk.bf16.vlgmr.msra.gmra.mxu0 %vm264_vm0, %v651_v20  ;;  %596 = vmatmul.mubr.msk.bf16.vlgmr.msra.gmra.mxu1 %vm264_vm0, %v652_v21 }
  0x8a   : > { %v375_v22 = vpop.permute.xlu1 %374  ;;  %v365_v23 = vpop.permute.xlu0 %364 }
  0x8e   : > { %v380_v24 = vpop.permute.xlu1 %379  ;;  %v370_v25 = vpop.permute.xlu0 %369 }
  0x92   : > { %v390_v26 = vpop.permute.xlu1 %389  ;;  %v385_v27 = vpop.permute.xlu0 %384 }
  0x96   : > { %v400_v28 = vpop.permute.xlu1 %399  ;;  %v395_v29 = vpop.permute.xlu0 %394 }
  0x9b   : > { %v416_v30 = vpop.permute.xlu1 %415  ;;  %v412_v31 = vpop.permute.xlu0 %411 }
  0x9f   : > { %v420_v32 = vpop.permute.xlu1 %419  ;;  %v424_v33 = vpop.permute.xlu0 %423 }
  0xa3   : > { %v428_v34 = vpop.permute.xlu1 %427  ;;  %v432_v37 = vpop.permute.xlu0 %431 }
  0xa7   : > { %v436_v38 = vpop.permute.xlu1 %435  ;;  %v440_v57 = vpop.permute.xlu0 %439 }
  0xf0   : > { %v593_v35 = vpop.f32.mrf.mxu0  ;;  %v597_v36 = vpop.f32.mrf.mxu1 }
  0xf1   : > { %v404_v39 = vsub.f32 %v593_v35, %v375_v22  ;;  %v408_v40 = vsub.f32 %v597_v36, %v395_v29 }
  0xf2   : > { %v323_v41 = vpop.f32.mrf.mxu0  ;;  %v339_v42 = vpop.f32.mrf.mxu1 }
  0xf3   : > { %v444_v43 = vmul.f32 %v420_v32, %v404_v39  ;;  %v448_v44 = vmul.f32 %v436_v38, %v408_v40  ;;  %v402_v45 = vsub.f32 %v323_v41, %v365_v23  ;;  %v406_v46 = vsub.f32 %v339_v42, %v385_v27 }
  0xf4   : > { %v594_v47 = vpop.f32.mrf.mxu0  ;;  %v598_v48 = vpop.f32.mrf.mxu1 }
  0xf5   : > { %v452_v49 = vmax.f32 %v444_v43, 0.0  ;;  %v456_v50 = vmax.f32 %v448_v44, 0.0  ;;  %v442_v51 = vmul.f32 %v412_v31, %v402_v45  ;;  %v446_v52 = vmul.f32 %v428_v34, %v406_v46 }
  0xf6   : > { %v405_v53 = vsub.f32 %v594_v47, %v380_v24  ;;  %v409_v54 = vsub.f32 %v598_v48, %v400_v28  ;;  %v326_v55 = vpop.f32.mrf.mxu0  ;;  %v342_v56 = vpop.f32.mrf.mxu1 }
  0xf7   : > { %461 = vst.msk [vmem:[%s785_s24 + $0x10] sm:$0xff] %vm458_vm1, %v452_v49  ;;  %465 = vst.msk [vmem:[%s785_s24 + $0x30] sm:$0xff] %vm458_vm1, %v456_v50  ;;  %v450_v58 = vmax.f32 %v442_v51, 0.0  ;;  %v454_v59 = vmax.f32 %v446_v52, 0.0  ;;  %v403_v60 = vsub.f32 %v326_v55, %v370_v25  ;;  %v407_v61 = vsub.f32 %v342_v56, %v390_v26 }
  0xf8   : > { %v445_v62 = vmul.f32 %v424_v33, %v405_v53  ;;  %v449_v63 = vmul.f32 %v440_v57, %v409_v54 }
  0xf9   : > { %459 = vst.msk [vmem:[%s785_s24] sm:$0xff] %vm458_vm1, %v450_v58  ;;  %463 = vst.msk [vmem:[%s785_s24 + $0x20] sm:$0xff] %vm458_vm1, %v454_v59  ;;  %v443_v0 = vmul.f32 %v416_v30, %v403_v60  ;;  %v447_v1 = vmul.f32 %v432_v37, %v407_v61 }
  0xfa   : > { %v453_v2 = vmax.f32 %v445_v62, 0.0  ;;  %v457_v3 = vmax.f32 %v449_v63, 0.0 }
  0xfb   : > { %v451_v4 = vmax.f32 %v443_v0, 0.0  ;;  %v455_v5 = vmax.f32 %v447_v1, 0.0 }
  0xfc   : > { %462 = vst.msk [vmem:[%s785_s24 + $0x18] sm:$0xff] %vm458_vm1, %v453_v2  ;;  %466 = vst.msk [vmem:[%s785_s24 + $0x38] sm:$0xff] %vm458_vm1, %v457_v3 }
  0xfd   : > { %460 = vst.msk [vmem:[%s785_s24 + $0x8] sm:$0xff] %vm458_vm1, %v451_v4  ;;  %464 = vst.msk [vmem:[%s785_s24 + $0x28] sm:$0xff] %vm458_vm1, %v455_v5 }
  0xfe PF: > { %s13_s14 = sadd.s32 1, %s675_s14   ;;  %s816_s12 = smov %s671_s13 }
  0xff   : > { %p10_p5 = scmp.ge.s32.totalorder %s13_s14, 4   ;;  %s817_s13 = smov %s819_s15 }
 0x101   :  { %12 = sbr.rel (!%p10_p5) target bundleno = 2 (0x2), region = 62 }

</bundles_post_ra>
